<compile_context>
chip_gen: v6e
topology: v6e:2x2x1
jax: 0.10.0
libtpu: 0.0.40
codegen_flags: <defaults>
</compile_context>

<pallas_src>
import functools

import jax
import jax.numpy as jnp
from jax.experimental import pallas as pl
from jax.experimental.pallas import tpu as pltpu


def _node_apply_kernel(h_ref, w_ref, b_ref, o_ref):
    """relu(h @ W + b) on one (tile_n, tile_out) output tile."""
    # Cast h to bf16 in-kernel (VPU, hidden under DMA); MXU accumulates in f32.
    h_bf16 = h_ref[...].astype(jnp.bfloat16)
    y = jnp.dot(h_bf16, w_ref[...], preferred_element_type=jnp.float32)
    y = y + b_ref[...]                                   # (1, tile_out) broadcast
    o_ref[...] = jnp.maximum(y, 0.0).astype(o_ref.dtype)


def _round_up(x, m):
    return ((x + m - 1) // m) * m


def _device_plan():
    """(vmem budget for double-buffered tiles, node-tile cap, vmem_limit_bytes)."""
    try:
        kind = jax.devices()[0].device_kind.lower()
    except Exception:  # pragma: no cover - defensive; assume conservative plan
        kind = ""
    if "v6" in kind:
        # v6e: 128 MiB physical VMEM, 32 MiB scoped default -> raise the limit.
        return 40 * 1024 * 1024, 8192, 64 * 1024 * 1024
    if "7" in kind:
        # v7x: 64 MiB physical per TC (2 TCs), 32 MiB scoped default.
        return 24 * 1024 * 1024, 4096, 32 * 1024 * 1024
    # v5e (and unknown): 16 MiB scoped default -> conservative budget.
    return 12 * 1024 * 1024, 2048, None


def _pick_tile_n(n, in_feats, tile_out, budget, cap, h_itemsize, out_itemsize):
    """Largest 16-row-aligned node tile whose double-buffered footprint fits the
    generation budget, kept to >=2 grid steps (pipelining / dual-TC) and nudged
    to an even step count."""
    if n <= 16:
        return n                                     # full dim: always layout-legal

    w_bytes = 2 * (in_feats * tile_out * 2 + tile_out * 4)   # bf16 W + f32 bias, x2 bufs
    per_row = 2 * (in_feats * h_itemsize + tile_out * out_itemsize)
    fit = max((budget - w_bytes) // per_row, 16)

    tile = min(fit, cap)
    tile = min(tile, _round_up(pl.cdiv(n, 2), 16))   # keep at least 2 node steps
    tile = max(16, (tile // 16) * 16)                # bf16 sublane packing: 16-row multiple

    steps = pl.cdiv(n, tile)
    if steps > 1 and steps % 2 == 1:                 # even step count -> balanced dual-TC
        alt = _round_up(pl.cdiv(n, steps + 1), 16)
        if alt >= 16 and pl.cdiv(n, alt) % 2 == 0:
            tile = alt
    return tile


@functools.partial(jax.jit, static_argnames=("tile_n",))
def node_apply(h, weight, bias, *, tile_n=None):
    """Pallas equivalent of NodeApplyModule.forward.

    h:      [N, in_feats]
    weight: [out_feats, in_feats]   (PyTorch nn.Linear layout)
    bias:   [out_feats]
    returns [N, out_feats] = relu(h @ weight.T + bias)
    """
    n, in_feats = h.shape
    out_feats = weight.shape[0]
    out_dtype = h.dtype
    h_itemsize = jnp.dtype(h.dtype).itemsize
    out_itemsize = jnp.dtype(out_dtype).itemsize

    budget, cap, vmem_limit = _device_plan()

    # GCN-typical widths: full-width output, 1-D grid, weight/bias VMEM-resident.
    # Only a very wide 128-multiple out_feats gets lane tiling (2-D grid).
    if out_feats % 128 == 0 and out_feats > 1024:
        tile_out = 1024
    else:
        tile_out = out_feats

    if tile_n is None:
        tile_n = _pick_tile_n(n, in_feats, tile_out, budget, cap,
                              h_itemsize, out_itemsize)

    # The tiny weight is transposed+cast once in the wrapper (one fused XLA copy);
    # the kernel sees the MXU-native [in_feats, out_feats] layout.  h is NOT
    # pre-cast — it is DMA'd in its native dtype and cast inside the kernel.
    w_in = weight.T.astype(jnp.bfloat16)
    b_in = bias.astype(jnp.float32).reshape(1, out_feats)

    cost = pl.CostEstimate(
        flops=2 * n * in_feats * out_feats,
        transcendentals=0,
        bytes_accessed=(n * in_feats * h_itemsize     # h, native dtype
                        + in_feats * out_feats * 2    # bf16 weight
                        + out_feats * 4               # f32 bias
                        + n * out_feats * out_itemsize),
    )

    if tile_out == out_feats:
        grid = (pl.cdiv(n, tile_n),)
        in_specs = [
            pl.BlockSpec((tile_n, in_feats), lambda i: (i, 0)),
            pl.BlockSpec((in_feats, out_feats), lambda i: (0, 0)),
            pl.BlockSpec((1, out_feats), lambda i: (0, 0)),
        ]
        out_specs = pl.BlockSpec((tile_n, out_feats), lambda i: (i, 0))
        dim_sems = ("parallel",)
    else:
        grid = (pl.cdiv(n, tile_n), pl.cdiv(out_feats, tile_out))
        in_specs = [
            pl.BlockSpec((tile_n, in_feats), lambda i, j: (i, 0)),
            pl.BlockSpec((in_feats, tile_out), lambda i, j: (0, j)),
            pl.BlockSpec((1, tile_out), lambda i, j: (0, j)),
        ]
        out_specs = pl.BlockSpec((tile_n, tile_out), lambda i, j: (i, j))
        dim_sems = ("parallel", "parallel")

    cp_kwargs = dict(dimension_semantics=dim_sems)
    if vmem_limit is not None:
        cp_kwargs["vmem_limit_bytes"] = vmem_limit

    return pl.pallas_call(
        _node_apply_kernel,
        out_shape=jax.ShapeDtypeStruct((n, out_feats), out_dtype),
        grid_spec=pltpu.PrefetchScalarGridSpec(
            num_scalar_prefetch=0,
            grid=grid,
            in_specs=in_specs,
            out_specs=out_specs,
        ),
        compiler_params=pltpu.CompilerParams(**cp_kwargs),
        cost_estimate=cost,
    )(h, w_in, b_in)


if __name__ == "__main__":
    # Deterministic synthetic parameters (matching nn.Linear init ranges).
    key = jax.random.PRNGKey(0)
    k_h, k_w, k_b = jax.random.split(key, 3)

    # Small GCN-layer-like shapes; 256 nodes -> a 2-step pipelined node grid.
    n_nodes, in_feats, out_feats = 256, 32, 16

    bound = 1.0 / float(jnp.sqrt(in_feats))
    h = jax.random.normal(k_h, (n_nodes, in_feats), dtype=jnp.float32)
    weight = jax.random.uniform(
        k_w, (out_feats, in_feats), minval=-bound, maxval=bound, dtype=jnp.float32
    )
    bias = jax.random.uniform(
        k_b, (out_feats,), minval=-bound, maxval=bound, dtype=jnp.float32
    )

    out = jax.block_until_ready(node_apply(h, weight, bias))
    assert out.shape == (n_nodes, out_feats)

    # Tight check against a reference that uses the same bf16-rounded MXU operands.
    h_r = h.astype(jnp.bfloat16).astype(jnp.float32)
    w_r = weight.astype(jnp.bfloat16).astype(jnp.float32)
    ref_bf16 = jnp.maximum(h_r @ w_r.T + bias, 0.0)
    assert jnp.allclose(out, ref_bf16, atol=1e-4, rtol=1e-4), "mismatch vs bf16-input reference"

    # Loose check against the full-f32 module semantics (bf16 operand rounding only).
    ref_f32 = jnp.maximum(h @ weight.T + bias, 0.0)
    assert jnp.allclose(out, ref_f32, atol=5e-2, rtol=5e-2), "mismatch vs f32 reference"

    print("KERNEL_OK")
</pallas_src>

<mosaic_0001>
module attributes {stable_mosaic.version = 11 : i64} {
  func.func @_node_apply_kernel(%arg0: i32, %arg1: memref<128x32xf32, #tpu.memory_space<vmem>>, %arg2: memref<32x16xbf16, #tpu.memory_space<vmem>>, %arg3: memref<1x16xf32, #tpu.memory_space<vmem>>, %arg4: memref<128x16xf32, #tpu.memory_space<vmem>>) attributes {dimension_semantics = [#tpu.dimension_semantics<parallel>], iteration_bounds = array<i64: 2>, scalar_prefetch = 0 : i64, scratch_operands = 0 : i64, tpu.core_type = #tpu.core_type<tc>, window_params = [{transform_indices = @transform_0, window_bounds = array<i64: 128, 32>}, {pipeline_mode = #tpu.pipeline_mode<synchronous>, transform_indices = @transform_1, window_bounds = array<i64: 32, 16>}, {pipeline_mode = #tpu.pipeline_mode<synchronous>, transform_indices = @transform_2, window_bounds = array<i64: 1, 16>}, {transform_indices = @transform_3, window_bounds = array<i64: 128, 16>}]} {
    %c0 = arith.constant 0 : index
    %c0_0 = arith.constant 0 : index
    %0 = vector.load %arg1[%c0, %c0_0] : memref<128x32xf32, #tpu.memory_space<vmem>>, vector<128x32xf32>
    %1 = arith.truncf %0 : vector<128x32xf32> to vector<128x32xbf16>
    %c0_1 = arith.constant 0 : index
    %c0_2 = arith.constant 0 : index
    %2 = vector.load %arg2[%c0_1, %c0_2] : memref<32x16xbf16, #tpu.memory_space<vmem>>, vector<32x16xbf16>
    %cst = arith.constant dense<0.000000e+00> : vector<128x16xf32>
    %3 = tpu.matmul %1, %2, %cst {dimension_numbers = #tpu.dot_dimension_numbers<[1], [0], [0], [1], [0, 0, 1, 1], [], []>} : vector<128x32xbf16>, vector<32x16xbf16>, vector<128x16xf32> -> vector<128x16xf32>
    %c0_3 = arith.constant 0 : index
    %c0_4 = arith.constant 0 : index
    %4 = vector.load %arg3[%c0_3, %c0_4] : memref<1x16xf32, #tpu.memory_space<vmem>>, vector<1x16xf32>
    %5 = vector.broadcast %4 : vector<1x16xf32> to vector<128x16xf32>
    %6 = arith.addf %3, %5 : vector<128x16xf32>
    %cst_5 = arith.constant 0.000000e+00 : f32
    %7 = vector.broadcast %cst_5 : f32 to vector<128x16xf32>
    %8 = arith.maximumf %6, %7 : vector<128x16xf32>
    %c0_6 = arith.constant 0 : index
    %c0_7 = arith.constant 0 : index
    %9 = vector.load %arg4[%c0_6, %c0_7] : memref<128x16xf32, #tpu.memory_space<vmem>>, vector<128x16xf32>
    tpu.vector_store %arg4[%c0_6, %c0_7], %8 {strides = array<i32>} : memref<128x16xf32, #tpu.memory_space<vmem>>, vector<128x16xf32>,
    return
  }
  func.func @transform_0(%arg0: i32) -> (i32, i32) {
    %c0_i32 = arith.constant 0 : i32
    %c0_i32_0 = arith.constant 0 : i32
    return %arg0, %c0_i32 : i32, i32
  }
  func.func @transform_1(%arg0: i32) -> (i32, i32) {
    %c0_i32 = arith.constant 0 : i32
    %c0_i32_0 = arith.constant 0 : i32
    %c0_i32_1 = arith.constant 0 : i32
    return %c0_i32, %c0_i32_0 : i32, i32
  }
  func.func @transform_2(%arg0: i32) -> (i32, i32) {
    %c0_i32 = arith.constant 0 : i32
    %c0_i32_0 = arith.constant 0 : i32
    %c0_i32_1 = arith.constant 0 : i32
    return %c0_i32, %c0_i32_0 : i32, i32
  }
  func.func @transform_3(%arg0: i32) -> (i32, i32) {
    %c0_i32 = arith.constant 0 : i32
    %c0_i32_0 = arith.constant 0 : i32
    return %arg0, %c0_i32 : i32, i32
  }
}

</mosaic_0001>

<bundles_post_ra>
// kernel: node_apply.1
= control target key start
LH: loop header
LB: loop body
LE: loop exit
PB: predicated region body
PF: predicated region fallthrough
CT: control target
= control target key end

     0   :  { %s527_s12 = smov 0   ;;  %s620_s0 = inlined_call_operand.vmem [shape: f32[256,32], index: 0, kind: input, shape index: {}]   ;;  %s621_s1 = inlined_call_operand.vmem [shape: bf16[32,16], index: 1, kind: input, shape index: {}]   ;;  %s622_s2 = inlined_call_operand.vmem [shape: f32[1,16], index: 2, kind: input, shape index: {}]   ;;  %s623_s3 = inlined_call_operand.vmem [shape: f32[256,16], index: 3, kind: output, shape index: {}]  }
   0x1 LB: > { %s433_s13 = sadd.s32 4294967295, %s505_s12   ;;  %p437_p0 = scmp.ge.s32.totalorder %s505_s12, 1  ;;  %s505_s12 = sphi %s527_s12, %s13_s12  }
   0x2   : > { %p138_p1 = scmp.lt.s32.totalorder %s505_s12, 3 }
   0x4   : > { %p139_p2 = pnand %p437_p0, %p138_p1 }
   0x5   : > { %s438_s16 = sshll.u32 (!%p139_p2), %s433_s13, 4 }
   0x6   : > { %142 = sbr.rel (%p139_p2) target bundleno = 232 (0xe8), region = 32  ;;  %p163_p3 = scmp.lt.s32.totalorder (!%p139_p2), %s438_s16, 31 }
   0xb   : > { %v497_v0 = vld [vmem:[%s621_s1 + $0x8] sm:$0xff]   ;;  %v498_v1 = vld [vmem:[%s621_s1] sm:$0xff]   ;;  %s625_s16 = smov (!%p163_p3, %s438_s16), 31  ;;  %vm222_vm0 = vcmask 261120   ;;  %vm360_vm1 = vcmask 130048  }
   0xc   : > { %465 = vmatprep.subr.bf16.mxu0 %v497_v0  ;;  %485 = vmatprep.subr.bf16.mxu1 %v497_v0  ;;  %s439_s19 = sshll.u32 %s625_s16, 3  ;;  %v442_v26 = vld [vmem:[%s622_s2] ss:$0 sm:$0xff] }
   0xd   : > { %466 = vmatpush3.bf16.msra.mxu0 %v497_v0  ;;  %487 = vmatpush3.bf16.msra.mxu1 %v497_v0  ;;  %s549_s22 = scalar_lea.vmem %s620_s0, %s439_s19  ;;  %s583_s27 = scalar_lea.vmem %s623_s3, %s439_s19 }
   0xe   : > { %467 = vmatprep.subr.bf16.mxu0 %v498_v1  ;;  %486 = vmatprep.subr.bf16.mxu1 %v498_v1  ;;  %v175_v2 = vld [vmem:[%s549_s22] sm:$0xff]  ;;  %v176_v3 = vld [vmem:[%s549_s22 + $0x8] sm:$0xff]  ;;  %v177_v7 = vld [vmem:[%s549_s22 + $0x10] sm:$0xff] }
   0xf   : > { %v183_v4 = vld [vmem:[%s549_s22 + $0x40] sm:$0xff]  ;;  %v191_v5 = vpack.c.bf16 %v176_v3, %v175_v2  ;;  %v184_v6 = vld [vmem:[%s549_s22 + $0x48] sm:$0xff]  ;;  %v178_v8 = vld [vmem:[%s549_s22 + $0x18] sm:$0xff] }
  0x10   : > { %v195_v9 = vpack.c.bf16 %v184_v6, %v183_v4  ;;  %v192_v10 = vpack.c.bf16 %v178_v8, %v177_v7  ;;  %v185_v11 = vld [vmem:[%s549_s22 + $0x50] sm:$0xff]  ;;  %v186_v12 = vld [vmem:[%s549_s22 + $0x58] sm:$0xff]  ;;  %v179_v13 = vld [vmem:[%s549_s22 + $0x20] sm:$0xff] }
  0x11   : > { %468 = vmatpush3.bf16.msra.mxu0 %v498_v1  ;;  %488 = vmatpush3.bf16.msra.mxu1 %v498_v1  ;;  %v196_v14 = vpack.c.bf16 %v186_v12, %v185_v11  ;;  %v180_v15 = vld [vmem:[%s549_s22 + $0x28] sm:$0xff]  ;;  %v187_v16 = vld [vmem:[%s549_s22 + $0x60] sm:$0xff]  ;;  %v181_v20 = vld [vmem:[%s549_s22 + $0x30] sm:$0xff] }
  0x12   : > { %469 = vmatprep.mubr.msk.bf16.mxu0 %vm222_vm0, %v191_v5  ;;  %v188_v17 = vld [vmem:[%s549_s22 + $0x68] sm:$0xff]  ;;  %477 = vmatprep.mubr.msk.bf16.mxu1 %vm222_vm0, %v195_v9  ;;  %v193_v18 = vpack.c.bf16 %v180_v15, %v179_v13  ;;  %v182_v21 = vld [vmem:[%s549_s22 + $0x38] sm:$0xff]  ;;  %v189_v22 = vld [vmem:[%s549_s22 + $0x70] sm:$0xff] }
  0x13   : > { %v197_v19 = vpack.c.bf16 %v188_v17, %v187_v16  ;;  %v190_v23 = vld [vmem:[%s549_s22 + $0x78] sm:$0xff]  ;;  %v194_v24 = vpack.c.bf16 %v182_v21, %v181_v20 }
  0x14   : > { %470 = vmatmul.mubr.msk.bf16.vlgmr.msra.gmra.mxu0 %vm222_vm0, %v192_v10  ;;  %478 = vmatmul.mubr.msk.bf16.vlgmr.msra.gmra.mxu1 %vm222_vm0, %v196_v14  ;;  %v198_v25 = vpack.c.bf16 %v190_v23, %v189_v22 }
  0x15   : > { %473 = vmatprep.mubr.msk.bf16.mxu0 %vm222_vm0, %v193_v18  ;;  %481 = vmatprep.mubr.msk.bf16.mxu1 %vm222_vm0, %v197_v19 }
  0x1c   : > { %474 = vmatmul.mubr.msk.bf16.gmra.mxu0 %vm222_vm0, %v194_v24  ;;  %482 = vmatmul.mubr.msk.bf16.gmra.mxu1 %vm222_vm0, %v198_v25 }
  0xd4   : > { %v471_v27 = vpop.f32.mrf.mxu0  ;;  %v479_v29 = vpop.f32.mrf.mxu1 }
  0xd5   : > { %v290_v28 = vadd.f32 %v471_v27, %v442_v26  ;;  %v322_v30 = vadd.f32 %v479_v29, %v442_v26 }
  0xd6   : > { %v281_v31 = vpop.f32.mrf.mxu0  ;;  %v313_v34 = vpop.f32.mrf.mxu1 }
  0xd7   : > { %v346_v32 = vmax.f32 %v290_v28, 0.0  ;;  %v282_v33 = vadd.f32 %v442_v26, %v281_v31  ;;  %v354_v35 = vmax.f32 %v322_v30, 0.0  ;;  %v314_v36 = vadd.f32 %v442_v26, %v313_v34 }
  0xd8   : > { %v472_v37 = vpop.f32.mrf.mxu0  ;;  %v480_v40 = vpop.f32.mrf.mxu1 }
  0xd9   : > { %363 = vst.msk [vmem:[%s583_s27 + $0x10] sm:$0xff] %vm360_vm1, %v346_v32  ;;  %v344_v38 = vmax.f32 %v282_v33, 0.0  ;;  %v293_v39 = vadd.f32 %v472_v37, %v442_v26  ;;  %371 = vst.msk [vmem:[%s583_s27 + $0x50] sm:$0xff] %vm360_vm1, %v354_v35  ;;  %v352_v41 = vmax.f32 %v314_v36, 0.0  ;;  %v325_v42 = vadd.f32 %v480_v40, %v442_v26 }
  0xda   : > { %v284_v43 = vpop.f32.mrf.mxu0  ;;  %v316_v46 = vpop.f32.mrf.mxu1 }
  0xdb   : > { %361 = vst.msk [vmem:[%s583_s27] sm:$0xff] %vm360_vm1, %v344_v38  ;;  %v347_v44 = vmax.f32 %v293_v39, 0.0  ;;  %v285_v45 = vadd.f32 %v442_v26, %v284_v43  ;;  %369 = vst.msk [vmem:[%s583_s27 + $0x40] sm:$0xff] %vm360_vm1, %v352_v41  ;;  %v355_v47 = vmax.f32 %v325_v42, 0.0  ;;  %v317_v48 = vadd.f32 %v442_v26, %v316_v46 }
  0xdc   : > { %v475_v49 = vpop.f32.mrf.mxu0  ;;  %v483_v52 = vpop.f32.mrf.mxu1 }
  0xdd   : > { %364 = vst.msk [vmem:[%s583_s27 + $0x18] sm:$0xff] %vm360_vm1, %v347_v44  ;;  %v345_v50 = vmax.f32 %v285_v45, 0.0  ;;  %v306_v51 = vadd.f32 %v475_v49, %v442_v26  ;;  %372 = vst.msk [vmem:[%s583_s27 + $0x58] sm:$0xff] %vm360_vm1, %v355_v47  ;;  %v353_v53 = vmax.f32 %v317_v48, 0.0  ;;  %v338_v54 = vadd.f32 %v483_v52, %v442_v26 }
  0xde   : > { %v297_v55 = vpop.f32.mrf.mxu0  ;;  %v329_v58 = vpop.f32.mrf.mxu1 }
  0xdf   : > { %362 = vst.msk [vmem:[%s583_s27 + $0x8] sm:$0xff] %vm360_vm1, %v345_v50  ;;  %v350_v56 = vmax.f32 %v306_v51, 0.0  ;;  %v298_v57 = vadd.f32 %v442_v26, %v297_v55  ;;  %370 = vst.msk [vmem:[%s583_s27 + $0x48] sm:$0xff] %vm360_vm1, %v353_v53  ;;  %v358_v59 = vmax.f32 %v338_v54, 0.0  ;;  %v330_v60 = vadd.f32 %v442_v26, %v329_v58 }
  0xe0   : > { %v476_v61 = vpop.f32.mrf.mxu0  ;;  %v484_v0 = vpop.f32.mrf.mxu1 }
  0xe1   : > { %367 = vst.msk [vmem:[%s583_s27 + $0x30] sm:$0xff] %vm360_vm1, %v350_v56  ;;  %v348_v62 = vmax.f32 %v298_v57, 0.0  ;;  %v309_v63 = vadd.f32 %v476_v61, %v442_v26  ;;  %375 = vst.msk [vmem:[%s583_s27 + $0x70] sm:$0xff] %vm360_vm1, %v358_v59  ;;  %v356_v1 = vmax.f32 %v330_v60, 0.0  ;;  %v341_v2 = vadd.f32 %v484_v0, %v442_v26 }
  0xe2   : > { %v300_v3 = vpop.f32.mrf.mxu0  ;;  %v332_v6 = vpop.f32.mrf.mxu1 }
  0xe3   : > { %365 = vst.msk [vmem:[%s583_s27 + $0x20] sm:$0xff] %vm360_vm1, %v348_v62  ;;  %v351_v4 = vmax.f32 %v309_v63, 0.0  ;;  %v301_v5 = vadd.f32 %v442_v26, %v300_v3  ;;  %373 = vst.msk [vmem:[%s583_s27 + $0x60] sm:$0xff] %vm360_vm1, %v356_v1  ;;  %v359_v7 = vmax.f32 %v341_v2, 0.0  ;;  %v333_v8 = vadd.f32 %v442_v26, %v332_v6 }
  0xe5   : > { %368 = vst.msk [vmem:[%s583_s27 + $0x38] sm:$0xff] %vm360_vm1, %v351_v4  ;;  %v349_v9 = vmax.f32 %v301_v5, 0.0  ;;  %376 = vst.msk [vmem:[%s583_s27 + $0x78] sm:$0xff] %vm360_vm1, %v359_v7  ;;  %v357_v10 = vmax.f32 %v333_v8, 0.0 }
  0xe7   : > { %366 = vst.msk [vmem:[%s583_s27 + $0x28] sm:$0xff] %vm360_vm1, %v349_v9  ;;  %374 = vst.msk [vmem:[%s583_s27 + $0x68] sm:$0xff] %vm360_vm1, %v357_v10 }
  0xe8 PF: > { %s13_s12 = sadd.s32 1, %s505_s12  }
  0xe9   : > { %p10_p4 = scmp.ge.s32.totalorder %s13_s12, 4  }
  0xeb   :  { %12 = sbr.rel (!%p10_p4) target bundleno = 1 (0x1), region = 62 }

</bundles_post_ra>
